<compile_context>
chip_gen: v6e
topology: v6e:2x2x1
jax: 0.10.0
libtpu: 0.0.40
codegen_flags: <defaults>
</compile_context>

<pallas_src>
import functools
import math

import jax
import jax.numpy as jnp
from jax.experimental import pallas as pl
from jax.experimental.pallas import tpu as pltpu


def _round_up(x, m):
    return ((x + m - 1) // m) * m


def _sigmoid(x):
    # simple exp-based form; lowers cleanly to VPU/EUP ops
    return 1.0 / (1.0 + jnp.exp(-x))


def _softplus(x):
    # numerically stable softplus using only exp/log/abs/max
    return jnp.maximum(x, 0.0) + jnp.log(1.0 + jnp.exp(-jnp.abs(x)))


def _ode_rnn_encoder_kernel(z0_dim,
                            x_ref, w_ih_ref, w_hh_ref, b_ref,
                            w1_ref, b1_ref, w2_ref, b2_ref,
                            out_ref, h_sc, c_sc):
    t = pl.program_id(0)
    n_t = pl.num_programs(0)

    @pl.when(t == 0)
    def _init():
        h_sc[...] = jnp.zeros_like(h_sc)
        c_sc[...] = jnp.zeros_like(c_sc)

    h = h_sc[...]                      # (B, L)
    c = c_sc[...]                      # (B, L)

    # TODO(synk): z0_diffeq_solver(h, dt) is an externally injected module
    # (None by default in the spec); the ODE evolution of h between observation
    # times is left as identity here.

    x = x_ref[0]                       # (B, D_in)

    # LSTMCell gates: (B, 4L), lane-dense (4L is a multiple of 128 in the demo)
    gates = (jnp.dot(x, w_ih_ref[...], preferred_element_type=jnp.float32)
             + jnp.dot(h, w_hh_ref[...], preferred_element_type=jnp.float32)
             + b_ref[...])

    L = h.shape[-1]
    i_g = _sigmoid(gates[:, 0 * L:1 * L])
    f_g = _sigmoid(gates[:, 1 * L:2 * L])
    g_g = jnp.tanh(gates[:, 2 * L:3 * L])
    o_g = _sigmoid(gates[:, 3 * L:4 * L])

    c_new = f_g * c + i_g * g_g
    h_new = o_g * jnp.tanh(c_new)

    # get_mask: second half of the input holds the observation mask
    n_data = x.shape[-1] // 2
    mask = (jnp.sum(x[:, n_data:], axis=-1, keepdims=True) > 0.0).astype(jnp.float32)

    h_sc[...] = mask * h_new + (1.0 - mask) * h
    c_sc[...] = mask * c_new + (1.0 - mask) * c

    # final step: transform_z0 (Linear -> tanh -> Linear) + softplus on std lanes
    @pl.when(t == n_t - 1)
    def _final():
        hid = jnp.tanh(
            jnp.dot(h_sc[...], w1_ref[...], preferred_element_type=jnp.float32)
            + b1_ref[...])
        out = (jnp.dot(hid, w2_ref[...], preferred_element_type=jnp.float32)
               + b2_ref[...])                       # (B, OUT_PAD), lane-dense
        lane = jax.lax.broadcasted_iota(jnp.int32, out.shape, 1)
        is_std = (lane >= z0_dim) & (lane < 2 * z0_dim)
        out = jnp.where(is_std, _softplus(out), out)
        out_ref[...] = out.astype(out_ref.dtype)


def encoder_z0_odernn_forward(params, data, time_steps, run_backwards=True):
    """data: (batch, T, input_dim); time_steps: (batch, T) (only consumed by the
    identity ODE solver, see TODO in the kernel). Returns (mean_z0, std_z0),
    each of shape (1, batch, z0_dim)."""
    _ = time_steps
    B, T, D_in = data.shape
    w_ih = params["w_ih"]              # (D_in, 4L)
    w_hh = params["w_hh"]              # (L,    4L)
    b = params["b"]                    # (1,    4L)
    w1p = params["w1p"]                # (L,    HID_PAD)
    b1p = params["b1p"]                # (1,    HID_PAD)
    w2p = params["w2p"]                # (HID_PAD, OUT_PAD)
    b2p = params["b2p"]                # (1,    OUT_PAD)
    z0_dim = params["z0_dim"]
    L = w_hh.shape[0]
    hid_pad = w1p.shape[1]
    out_pad = w2p.shape[1]

    # time-major layout so each grid step streams a (B, D_in) full-extent block
    data_tm = jnp.transpose(data, (1, 0, 2))        # (T, B, D_in)

    if run_backwards:
        x_map = lambda t: (T - 1 - t, 0, 0)
    else:
        x_map = lambda t: (t, 0, 0)
    const2d = lambda t: (0, 0)

    cost = pl.CostEstimate(
        flops=int(T * (2 * B * D_in * 4 * L + 2 * B * L * 4 * L)
                  + 2 * B * L * hid_pad + 2 * B * hid_pad * out_pad),
        transcendentals=int(T * B * 5 * L + B * (hid_pad + 2 * out_pad)),
        bytes_accessed=int(4 * (T * B * D_in + D_in * 4 * L + L * 4 * L + 4 * L
                                + L * hid_pad + hid_pad + hid_pad * out_pad
                                + out_pad + B * out_pad)),
    )

    out_padded = pl.pallas_call(
        functools.partial(_ode_rnn_encoder_kernel, z0_dim),
        out_shape=jax.ShapeDtypeStruct((B, out_pad), jnp.float32),
        grid_spec=pltpu.PrefetchScalarGridSpec(
            num_scalar_prefetch=0,
            grid=(T,),
            in_specs=[
                pl.BlockSpec((1, B, D_in), x_map),       # streamed per-step input
                pl.BlockSpec((D_in, 4 * L), const2d),    # VMEM-resident weights
                pl.BlockSpec((L, 4 * L), const2d),
                pl.BlockSpec((1, 4 * L), const2d),
                pl.BlockSpec((L, hid_pad), const2d),
                pl.BlockSpec((1, hid_pad), const2d),
                pl.BlockSpec((hid_pad, out_pad), const2d),
                pl.BlockSpec((1, out_pad), const2d),
            ],
            out_specs=pl.BlockSpec((B, out_pad), const2d),
            scratch_shapes=[
                pltpu.VMEM((B, L), jnp.float32),         # h carried across steps
                pltpu.VMEM((B, L), jnp.float32),         # c carried across steps
            ],
        ),
        compiler_params=pltpu.CompilerParams(
            dimension_semantics=("arbitrary",),          # time recurrence: sequential
            vmem_limit_bytes=32 * 1024 * 1024,
        ),
        cost_estimate=cost,
    )(data_tm, w_ih, w_hh, b, w1p, b1p, w2p, b2p)

    mean_z0 = out_padded[:, :z0_dim].reshape(1, B, z0_dim)
    std_z0 = out_padded[:, z0_dim:2 * z0_dim].reshape(1, B, z0_dim)
    return mean_z0, std_z0


def init_encoder_params(key, latent_dim, input_dim, z0_dim=None, dtype=jnp.float32):
    if z0_dim is None:
        z0_dim = latent_dim
    L = latent_dim
    k1, k2, k3, k4, k5 = jax.random.split(key, 5)

    # nn.LSTMCell default init: uniform(-1/sqrt(L), 1/sqrt(L)); stored directly
    # in (K, N) matmul layout so the wrapper never transposes at call time.
    bound = 1.0 / math.sqrt(L)
    w_ih = jax.random.uniform(k1, (input_dim, 4 * L), minval=-bound, maxval=bound, dtype=dtype)
    w_hh = jax.random.uniform(k2, (L, 4 * L), minval=-bound, maxval=bound, dtype=dtype)
    b_ih = jax.random.uniform(k3, (4 * L,), minval=-bound, maxval=bound, dtype=dtype)
    b_hh = jax.random.uniform(k4, (4 * L,), minval=-bound, maxval=bound, dtype=dtype)
    b = (b_ih + b_hh).reshape(1, 4 * L)

    # transform_z0 = Linear(L, 100) -> Tanh -> Linear(100, 2*z0_dim)
    # init_network_weights: weight ~ N(0, 0.1), bias = 0.
    n_hidden = 100
    kw1, kw2 = jax.random.split(k5)
    w1 = (0.1 * jax.random.normal(kw1, (L, n_hidden))).astype(dtype)
    b1 = jnp.zeros((n_hidden,), dtype)
    w2 = (0.1 * jax.random.normal(kw2, (n_hidden, 2 * z0_dim))).astype(dtype)
    b2 = jnp.zeros((2 * z0_dim,), dtype)

    # zero-pad to lane-dense (multiples of 128) widths; padding is exact
    # (padded hidden units have zero weight+bias, padded outputs are sliced off)
    hid_pad = _round_up(n_hidden, 128)
    out_pad = _round_up(2 * z0_dim, 128)
    w1p = jnp.zeros((L, hid_pad), dtype).at[:, :n_hidden].set(w1)
    b1p = jnp.zeros((1, hid_pad), dtype).at[:, :n_hidden].set(b1)
    w2p = jnp.zeros((hid_pad, out_pad), dtype).at[:n_hidden, :2 * z0_dim].set(w2)
    b2p = jnp.zeros((1, out_pad), dtype).at[:, :2 * z0_dim].set(b2)

    return dict(w_ih=w_ih, w_hh=w_hh, b=b,
                w1=w1, b1=b1, w2=w2, b2=b2,
                w1p=w1p, b1p=b1p, w2p=w2p, b2p=b2p,
                z0_dim=z0_dim)


def reference_forward(params, data, time_steps, run_backwards=True):
    """Pure-JAX replica of the PyTorch forward (identity ODE solver)."""
    _ = time_steps
    B, T, D = data.shape
    L = params["w_hh"].shape[0]
    z0 = params["z0_dim"]
    hp = jax.lax.Precision.HIGHEST
    h = jnp.zeros((B, L), jnp.float32)
    c = jnp.zeros((B, L), jnp.float32)
    order = range(T - 1, -1, -1) if run_backwards else range(T)
    for i in order:
        x = data[:, i, :]
        gates = (jnp.dot(x, params["w_ih"], precision=hp)
                 + jnp.dot(h, params["w_hh"], precision=hp)
                 + params["b"])
        i_g = jax.nn.sigmoid(gates[:, 0 * L:1 * L])
        f_g = jax.nn.sigmoid(gates[:, 1 * L:2 * L])
        g_g = jnp.tanh(gates[:, 2 * L:3 * L])
        o_g = jax.nn.sigmoid(gates[:, 3 * L:4 * L])
        c_new = f_g * c + i_g * g_g
        h_new = o_g * jnp.tanh(c_new)
        mask = (jnp.sum(x[:, D // 2:], axis=-1, keepdims=True) > 0).astype(jnp.float32)
        h = mask * h_new + (1.0 - mask) * h
        c = mask * c_new + (1.0 - mask) * c
    hid = jnp.tanh(jnp.dot(h, params["w1"], precision=hp) + params["b1"])
    out = jnp.dot(hid, params["w2"], precision=hp) + params["b2"]
    mean = out[:, :z0].reshape(1, B, z0)
    std = jax.nn.softplus(out[:, z0:]).reshape(1, B, z0)
    return mean, std


if __name__ == "__main__":
    key = jax.random.PRNGKey(0)
    k_val, k_mask, k_time, k_param = jax.random.split(key, 4)

    batch, seq = 8, 8
    input_dim, latent_dim = 64, 32     # input_dim = 2 * n_data_dims (values | obs mask)

    obs_mask = jax.random.bernoulli(
        k_mask, 0.05, (batch, seq, input_dim // 2)).astype(jnp.float32)
    values = jax.random.normal(
        k_val, (batch, seq, input_dim // 2), dtype=jnp.float32) * obs_mask
    data = jnp.concatenate([values, obs_mask], axis=-1)           # (B, T, D_in)
    time_steps = jnp.sort(jax.random.uniform(k_time, (batch, seq)), axis=-1)

    params = init_encoder_params(k_param, latent_dim, input_dim)

    mean_z0, std_z0 = encoder_z0_odernn_forward(
        params, data, time_steps, run_backwards=True)
    mean_z0, std_z0 = jax.block_until_ready((mean_z0, std_z0))

    ref_mean, ref_std = reference_forward(params, data, time_steps, run_backwards=True)

    assert mean_z0.shape == (1, batch, latent_dim)
    assert std_z0.shape == (1, batch, latent_dim)
    assert not bool(jnp.isnan(mean_z0).any()) and not bool(jnp.isnan(std_z0).any())
    assert jnp.allclose(mean_z0, ref_mean, atol=1e-3, rtol=1e-3)
    assert jnp.allclose(std_z0, ref_std, atol=1e-3, rtol=1e-3)

    print("KERNEL_OK")
</pallas_src>

<mosaic_0001>
module attributes {stable_mosaic.version = 11 : i64} {
  func.func @_ode_rnn_encoder_kernel(%arg0: i32, %arg1: memref<1x8x64xf32, #tpu.memory_space<vmem>>, %arg2: memref<64x128xf32, #tpu.memory_space<vmem>>, %arg3: memref<32x128xf32, #tpu.memory_space<vmem>>, %arg4: memref<1x128xf32, #tpu.memory_space<vmem>>, %arg5: memref<32x128xf32, #tpu.memory_space<vmem>>, %arg6: memref<1x128xf32, #tpu.memory_space<vmem>>, %arg7: memref<128x128xf32, #tpu.memory_space<vmem>>, %arg8: memref<1x128xf32, #tpu.memory_space<vmem>>, %arg9: memref<8x128xf32, #tpu.memory_space<vmem>>, %arg10: memref<8x32xf32, #tpu.memory_space<vmem>>, %arg11: memref<8x32xf32, #tpu.memory_space<vmem>>) attributes {dimension_semantics = [#tpu.dimension_semantics<arbitrary>], iteration_bounds = array<i64: 8>, scalar_prefetch = 0 : i64, scratch_operands = 2 : i64, tpu.core_type = #tpu.core_type<tc>, window_params = [{transform_indices = @transform_0, window_bounds = array<i64: 1, 8, 64>}, {pipeline_mode = #tpu.pipeline_mode<synchronous>, transform_indices = @transform_1, window_bounds = array<i64: 64, 128>}, {pipeline_mode = #tpu.pipeline_mode<synchronous>, transform_indices = @transform_2, window_bounds = array<i64: 32, 128>}, {pipeline_mode = #tpu.pipeline_mode<synchronous>, transform_indices = @transform_3, window_bounds = array<i64: 1, 128>}, {pipeline_mode = #tpu.pipeline_mode<synchronous>, transform_indices = @transform_4, window_bounds = array<i64: 32, 128>}, {pipeline_mode = #tpu.pipeline_mode<synchronous>, transform_indices = @transform_5, window_bounds = array<i64: 1, 128>}, {pipeline_mode = #tpu.pipeline_mode<synchronous>, transform_indices = @transform_6, window_bounds = array<i64: 128, 128>}, {pipeline_mode = #tpu.pipeline_mode<synchronous>, transform_indices = @transform_7, window_bounds = array<i64: 1, 128>}, {pipeline_mode = #tpu.pipeline_mode<synchronous>, transform_indices = @transform_8, window_bounds = array<i64: 8, 128>}]} {
    %c0_i32 = arith.constant 0 : i32
    %0 = arith.cmpi eq, %arg0, %c0_i32 : i32
    %1 = arith.extui %0 : i1 to i32
    %c0_i32_0 = arith.constant 0 : i32
    %2 = arith.cmpi ne, %1, %c0_i32_0 : i32
    scf.if %2 {
      %cst_32 = arith.constant 0.000000e+00 : f32
      %72 = vector.broadcast %cst_32 : f32 to vector<8x32xf32>
      %c0_33 = arith.constant 0 : index
      %c0_34 = arith.constant 0 : index
      %73 = vector.load %arg10[%c0_33, %c0_34] : memref<8x32xf32, #tpu.memory_space<vmem>>, vector<8x32xf32>
      tpu.vector_store %arg10[%c0_33, %c0_34], %72 {strides = array<i32>} : memref<8x32xf32, #tpu.memory_space<vmem>>, vector<8x32xf32>,
      %cst_35 = arith.constant 0.000000e+00 : f32
      %74 = vector.broadcast %cst_35 : f32 to vector<8x32xf32>
      %c0_36 = arith.constant 0 : index
      %c0_37 = arith.constant 0 : index
      %75 = vector.load %arg11[%c0_36, %c0_37] : memref<8x32xf32, #tpu.memory_space<vmem>>, vector<8x32xf32>
      tpu.vector_store %arg11[%c0_36, %c0_37], %74 {strides = array<i32>} : memref<8x32xf32, #tpu.memory_space<vmem>>, vector<8x32xf32>,
    } else {
    }
    %c0 = arith.constant 0 : index
    %c0_1 = arith.constant 0 : index
    %3 = vector.load %arg10[%c0, %c0_1] : memref<8x32xf32, #tpu.memory_space<vmem>>, vector<8x32xf32>
    %c0_2 = arith.constant 0 : index
    %c0_3 = arith.constant 0 : index
    %4 = vector.load %arg11[%c0_2, %c0_3] : memref<8x32xf32, #tpu.memory_space<vmem>>, vector<8x32xf32>
    %c0_4 = arith.constant 0 : index
    %c0_5 = arith.constant 0 : index
    %c0_6 = arith.constant 0 : index
    %5 = vector.load %arg1[%c0_4, %c0_5, %c0_6] : memref<1x8x64xf32, #tpu.memory_space<vmem>>, vector<1x8x64xf32>
    %6 = vector.shape_cast %5 : vector<1x8x64xf32> to vector<8x64xf32>
    %c0_7 = arith.constant 0 : index
    %c0_8 = arith.constant 0 : index
    %7 = vector.load %arg2[%c0_7, %c0_8] : memref<64x128xf32, #tpu.memory_space<vmem>>, vector<64x128xf32>
    %cst = arith.constant dense<0.000000e+00> : vector<8x128xf32>
    %8 = tpu.matmul %6, %7, %cst {dimension_numbers = #tpu.dot_dimension_numbers<[1], [0], [0], [1], [0, 0, 1, 1], [], []>} : vector<8x64xf32>, vector<64x128xf32>, vector<8x128xf32> -> vector<8x128xf32>
    %c0_9 = arith.constant 0 : index
    %c0_10 = arith.constant 0 : index
    %9 = vector.load %arg3[%c0_9, %c0_10] : memref<32x128xf32, #tpu.memory_space<vmem>>, vector<32x128xf32>
    %cst_11 = arith.constant dense<0.000000e+00> : vector<8x128xf32>
    %10 = tpu.matmul %3, %9, %cst_11 {dimension_numbers = #tpu.dot_dimension_numbers<[1], [0], [0], [1], [0, 0, 1, 1], [], []>} : vector<8x32xf32>, vector<32x128xf32>, vector<8x128xf32> -> vector<8x128xf32>
    %11 = arith.addf %8, %10 : vector<8x128xf32>
    %c0_12 = arith.constant 0 : index
    %c0_13 = arith.constant 0 : index
    %12 = vector.load %arg4[%c0_12, %c0_13] : memref<1x128xf32, #tpu.memory_space<vmem>>, vector<1x128xf32>
    %13 = vector.broadcast %12 : vector<1x128xf32> to vector<8x128xf32>
    %14 = arith.addf %11, %13 : vector<8x128xf32>
    %15 = vector.extract_strided_slice %14 {offsets = [0, 0], sizes = [8, 32], strides = [1, 1]} : vector<8x128xf32> to vector<8x32xf32>
    %cst_14 = arith.constant 0.000000e+00 : f32
    %16 = vector.broadcast %cst_14 : f32 to vector<8x32xf32>
    %17 = arith.subf %16, %15 : vector<8x32xf32>
    %18 = math.exp %17 : vector<8x32xf32>
    %cst_15 = arith.constant 1.000000e+00 : f32
    %19 = vector.broadcast %cst_15 : f32 to vector<8x32xf32>
    %20 = arith.addf %19, %18 : vector<8x32xf32>
    %cst_16 = arith.constant 1.000000e+00 : f32
    %21 = vector.broadcast %cst_16 : f32 to vector<8x32xf32>
    %22 = arith.divf %21, %20 : vector<8x32xf32>
    %23 = vector.extract_strided_slice %14 {offsets = [0, 32], sizes = [8, 32], strides = [1, 1]} : vector<8x128xf32> to vector<8x32xf32>
    %cst_17 = arith.constant 0.000000e+00 : f32
    %24 = vector.broadcast %cst_17 : f32 to vector<8x32xf32>
    %25 = arith.subf %24, %23 : vector<8x32xf32>
    %26 = math.exp %25 : vector<8x32xf32>
    %cst_18 = arith.constant 1.000000e+00 : f32
    %27 = vector.broadcast %cst_18 : f32 to vector<8x32xf32>
    %28 = arith.addf %27, %26 : vector<8x32xf32>
    %cst_19 = arith.constant 1.000000e+00 : f32
    %29 = vector.broadcast %cst_19 : f32 to vector<8x32xf32>
    %30 = arith.divf %29, %28 : vector<8x32xf32>
    %31 = vector.extract_strided_slice %14 {offsets = [0, 64], sizes = [8, 32], strides = [1, 1]} : vector<8x128xf32> to vector<8x32xf32>
    %32 = math.tanh %31 : vector<8x32xf32>
    %33 = vector.extract_strided_slice %14 {offsets = [0, 96], sizes = [8, 32], strides = [1, 1]} : vector<8x128xf32> to vector<8x32xf32>
    %cst_20 = arith.constant 0.000000e+00 : f32
    %34 = vector.broadcast %cst_20 : f32 to vector<8x32xf32>
    %35 = arith.subf %34, %33 : vector<8x32xf32>
    %36 = math.exp %35 : vector<8x32xf32>
    %cst_21 = arith.constant 1.000000e+00 : f32
    %37 = vector.broadcast %cst_21 : f32 to vector<8x32xf32>
    %38 = arith.addf %37, %36 : vector<8x32xf32>
    %cst_22 = arith.constant 1.000000e+00 : f32
    %39 = vector.broadcast %cst_22 : f32 to vector<8x32xf32>
    %40 = arith.divf %39, %38 : vector<8x32xf32>
    %41 = arith.mulf %30, %4 : vector<8x32xf32>
    %42 = arith.mulf %22, %32 : vector<8x32xf32>
    %43 = arith.addf %41, %42 : vector<8x32xf32>
    %44 = math.tanh %43 : vector<8x32xf32>
    %45 = arith.mulf %40, %44 : vector<8x32xf32>
    %46 = vector.extract_strided_slice %6 {offsets = [0, 32], sizes = [8, 32], strides = [1, 1]} : vector<8x64xf32> to vector<8x32xf32>
    %cst_23 = arith.constant dense<0.000000e+00> : vector<8xf32>
    %47 = vector.multi_reduction <add>, %46, %cst_23 [1] : vector<8x32xf32> to vector<8xf32>
    %48 = vector.shape_cast %47 : vector<8xf32> to vector<8x1xf32>
    %cst_24 = arith.constant 0.000000e+00 : f32
    %49 = vector.broadcast %cst_24 : f32 to vector<8x1xf32>
    %50 = arith.cmpf ogt, %48, %49 : vector<8x1xf32>
    %51 = arith.extui %50 : vector<8x1xi1> to vector<8x1xi32>
    %52 = arith.sitofp %51 : vector<8x1xi32> to vector<8x1xf32>
    %53 = vector.broadcast %52 : vector<8x1xf32> to vector<8x32xf32>
    %54 = arith.mulf %53, %45 : vector<8x32xf32>
    %cst_25 = arith.constant 1.000000e+00 : f32
    %55 = vector.broadcast %cst_25 : f32 to vector<8x1xf32>
    %56 = arith.subf %55, %52 : vector<8x1xf32>
    %57 = vector.broadcast %56 : vector<8x1xf32> to vector<8x32xf32>
    %58 = arith.mulf %57, %3 : vector<8x32xf32>
    %59 = arith.addf %54, %58 : vector<8x32xf32>
    %c0_26 = arith.constant 0 : index
    %c0_27 = arith.constant 0 : index
    %60 = vector.load %arg10[%c0_26, %c0_27] : memref<8x32xf32, #tpu.memory_space<vmem>>, vector<8x32xf32>
    tpu.vector_store %arg10[%c0_26, %c0_27], %59 {strides = array<i32>} : memref<8x32xf32, #tpu.memory_space<vmem>>, vector<8x32xf32>,
    %61 = vector.broadcast %52 : vector<8x1xf32> to vector<8x32xf32>
    %62 = arith.mulf %61, %43 : vector<8x32xf32>
    %cst_28 = arith.constant 1.000000e+00 : f32
    %63 = vector.broadcast %cst_28 : f32 to vector<8x1xf32>
    %64 = arith.subf %63, %52 : vector<8x1xf32>
    %65 = vector.broadcast %64 : vector<8x1xf32> to vector<8x32xf32>
    %66 = arith.mulf %65, %4 : vector<8x32xf32>
    %67 = arith.addf %62, %66 : vector<8x32xf32>
    %c0_29 = arith.constant 0 : index
    %c0_30 = arith.constant 0 : index
    %68 = vector.load %arg11[%c0_29, %c0_30] : memref<8x32xf32, #tpu.memory_space<vmem>>, vector<8x32xf32>
    tpu.vector_store %arg11[%c0_29, %c0_30], %67 {strides = array<i32>} : memref<8x32xf32, #tpu.memory_space<vmem>>, vector<8x32xf32>,
    %c7_i32 = arith.constant 7 : i32
    %69 = arith.cmpi eq, %arg0, %c7_i32 : i32
    %70 = arith.extui %69 : i1 to i32
    %c0_i32_31 = arith.constant 0 : i32
    %71 = arith.cmpi ne, %70, %c0_i32_31 : i32
    scf.if %71 {
      %c0_32 = arith.constant 0 : index
      %c0_33 = arith.constant 0 : index
      %72 = vector.load %arg10[%c0_32, %c0_33] : memref<8x32xf32, #tpu.memory_space<vmem>>, vector<8x32xf32>
      %c0_34 = arith.constant 0 : index
      %c0_35 = arith.constant 0 : index
      %73 = vector.load %arg5[%c0_34, %c0_35] : memref<32x128xf32, #tpu.memory_space<vmem>>, vector<32x128xf32>
      %cst_36 = arith.constant dense<0.000000e+00> : vector<8x128xf32>
      %74 = tpu.matmul %72, %73, %cst_36 {dimension_numbers = #tpu.dot_dimension_numbers<[1], [0], [0], [1], [0, 0, 1, 1], [], []>} : vector<8x32xf32>, vector<32x128xf32>, vector<8x128xf32> -> vector<8x128xf32>
      %c0_37 = arith.constant 0 : index
      %c0_38 = arith.constant 0 : index
      %75 = vector.load %arg6[%c0_37, %c0_38] : memref<1x128xf32, #tpu.memory_space<vmem>>, vector<1x128xf32>
      %76 = vector.broadcast %75 : vector<1x128xf32> to vector<8x128xf32>
      %77 = arith.addf %74, %76 : vector<8x128xf32>
      %78 = math.tanh %77 : vector<8x128xf32>
      %c0_39 = arith.constant 0 : index
      %c0_40 = arith.constant 0 : index
      %79 = vector.load %arg7[%c0_39, %c0_40] : memref<128x128xf32, #tpu.memory_space<vmem>>, vector<128x128xf32>
      %cst_41 = arith.constant dense<0.000000e+00> : vector<8x128xf32>
      %80 = tpu.matmul %78, %79, %cst_41 {dimension_numbers = #tpu.dot_dimension_numbers<[1], [0], [0], [1], [0, 0, 1, 1], [], []>} : vector<8x128xf32>, vector<128x128xf32>, vector<8x128xf32> -> vector<8x128xf32>
      %c0_42 = arith.constant 0 : index
      %c0_43 = arith.constant 0 : index
      %81 = vector.load %arg8[%c0_42, %c0_43] : memref<1x128xf32, #tpu.memory_space<vmem>>, vector<1x128xf32>
      %82 = vector.broadcast %81 : vector<1x128xf32> to vector<8x128xf32>
      %83 = arith.addf %80, %82 : vector<8x128xf32>
      %84 = tpu.iota {dimensions = array<i32: 1>} : vector<8x128xi32>
      %c32_i32 = arith.constant 32 : i32
      %85 = vector.broadcast %c32_i32 : i32 to vector<8x128xi32>
      %86 = arith.cmpi sge, %84, %85 : vector<8x128xi32>
      %c64_i32 = arith.constant 64 : i32
      %87 = vector.broadcast %c64_i32 : i32 to vector<8x128xi32>
      %88 = arith.cmpi slt, %84, %87 : vector<8x128xi32>
      %89 = arith.andi %86, %88 : vector<8x128xi1>
      %cst_44 = arith.constant 0.000000e+00 : f32
      %90 = vector.broadcast %cst_44 : f32 to vector<8x128xf32>
      %91 = arith.maximumf %83, %90 : vector<8x128xf32>
      %92 = math.absf %83 : vector<8x128xf32>
      %cst_45 = arith.constant 0.000000e+00 : f32
      %93 = vector.broadcast %cst_45 : f32 to vector<8x128xf32>
      %94 = arith.subf %93, %92 : vector<8x128xf32>
      %95 = math.exp %94 : vector<8x128xf32>
      %cst_46 = arith.constant 1.000000e+00 : f32
      %96 = vector.broadcast %cst_46 : f32 to vector<8x128xf32>
      %97 = arith.addf %96, %95 : vector<8x128xf32>
      %98 = math.log %97 : vector<8x128xf32>
      %99 = arith.addf %91, %98 : vector<8x128xf32>
      %100 = arith.select %89, %99, %83 : vector<8x128xi1>, vector<8x128xf32>
      %c0_47 = arith.constant 0 : index
      %c0_48 = arith.constant 0 : index
      %101 = vector.load %arg9[%c0_47, %c0_48] : memref<8x128xf32, #tpu.memory_space<vmem>>, vector<8x128xf32>
      tpu.vector_store %arg9[%c0_47, %c0_48], %100 {strides = array<i32>} : memref<8x128xf32, #tpu.memory_space<vmem>>, vector<8x128xf32>,
    } else {
    }
    return
  }
  func.func @transform_0(%arg0: i32) -> (i32, i32, i32) {
    %c7_i32 = arith.constant 7 : i32
    %0 = arith.subi %c7_i32, %arg0 : i32
    %c0_i32 = arith.constant 0 : i32
    %c0_i32_0 = arith.constant 0 : i32
    %c0_i32_1 = arith.constant 0 : i32
    return %0, %c0_i32, %c0_i32_0 : i32, i32, i32
  }
  func.func @transform_1(%arg0: i32) -> (i32, i32) {
    %c0_i32 = arith.constant 0 : i32
    %c0_i32_0 = arith.constant 0 : i32
    %c0_i32_1 = arith.constant 0 : i32
    return %c0_i32, %c0_i32_0 : i32, i32
  }
  func.func @transform_2(%arg0: i32) -> (i32, i32) {
    %c0_i32 = arith.constant 0 : i32
    %c0_i32_0 = arith.constant 0 : i32
    %c0_i32_1 = arith.constant 0 : i32
    return %c0_i32, %c0_i32_0 : i32, i32
  }
  func.func @transform_3(%arg0: i32) -> (i32, i32) {
    %c0_i32 = arith.constant 0 : i32
    %c0_i32_0 = arith.constant 0 : i32
    %c0_i32_1 = arith.constant 0 : i32
    return %c0_i32, %c0_i32_0 : i32, i32
  }
  func.func @transform_4(%arg0: i32) -> (i32, i32) {
    %c0_i32 = arith.constant 0 : i32
    %c0_i32_0 = arith.constant 0 : i32
    %c0_i32_1 = arith.constant 0 : i32
    return %c0_i32, %c0_i32_0 : i32, i32
  }
  func.func @transform_5(%arg0: i32) -> (i32, i32) {
    %c0_i32 = arith.constant 0 : i32
    %c0_i32_0 = arith.constant 0 : i32
    %c0_i32_1 = arith.constant 0 : i32
    return %c0_i32, %c0_i32_0 : i32, i32
  }
  func.func @transform_6(%arg0: i32) -> (i32, i32) {
    %c0_i32 = arith.constant 0 : i32
    %c0_i32_0 = arith.constant 0 : i32
    %c0_i32_1 = arith.constant 0 : i32
    return %c0_i32, %c0_i32_0 : i32, i32
  }
  func.func @transform_7(%arg0: i32) -> (i32, i32) {
    %c0_i32 = arith.constant 0 : i32
    %c0_i32_0 = arith.constant 0 : i32
    %c0_i32_1 = arith.constant 0 : i32
    return %c0_i32, %c0_i32_0 : i32, i32
  }
  func.func @transform_8(%arg0: i32) -> (i32, i32) {
    %c0_i32 = arith.constant 0 : i32
    %c0_i32_0 = arith.constant 0 : i32
    %c0_i32_1 = arith.constant 0 : i32
    return %c0_i32, %c0_i32_0 : i32, i32
  }
}

</mosaic_0001>

<bundles_post_ra>
// kernel: tpu_custom_call.1
= control target key start
LH: loop header
LB: loop body
LE: loop exit
PB: predicated region body
PF: predicated region fallthrough
CT: control target
= control target key end

     0   :  { %13 = vsyncpa [#allocation5], 0  ;;  %s1651_s0 = inlined_call_operand.hbm [shape: f32[8,8,64], index: 0, kind: input, shape index: {}]   ;;  %s1652_s1 = inlined_call_operand.hbm [shape: f32[64,128], index: 1, kind: input, shape index: {}]   ;;  %s1653_s2 = inlined_call_operand.hbm [shape: f32[32,128], index: 2, kind: input, shape index: {}]   ;;  %s1654_s3 = inlined_call_operand.vmem [shape: f32[1,128], index: 3, kind: input, shape index: {}]   ;;  %s1655_s4 = inlined_call_operand.hbm [shape: f32[32,128], index: 4, kind: input, shape index: {}]   ;;  %s1656_s5 = inlined_call_operand.vmem [shape: f32[1,128], index: 5, kind: input, shape index: {}]   ;;  %s1657_s6 = inlined_call_operand.hbm [shape: f32[128,128], index: 6, kind: input, shape index: {}]   ;;  %s1658_s7 = inlined_call_operand.vmem [shape: f32[1,128], index: 7, kind: input, shape index: {}]   ;;  %s1659_s8 = inlined_call_operand.hbm [shape: f32[8,128], index: 8, kind: output, shape index: {}]  }
   0x1   :  { %15 = vsyncpa [#allocation5 + $0x1], 0 }
   0x2   :  { %16 = vsyncpa [#allocation8], 0 }
   0x3   :  { %17 = vsyncpa [#allocation11], 0 }
   0x4   :  { %18 = vsyncpa [#allocation6], 0  ;;  %s1421_s27 = smov 0   ;;  %s1423_s28 = smov 0  }
   0x5   :  { %s1425_s29 = smov 0   ;;  %s1427_s30 = smov 0  }
   0x6 LB: > { %s1360_s9 = smov [#allocation7]   ;;  %s1442_s11 = sadd.s32 4294967295, %s1358_s30   ;;  %s1358_s30 = sphi %s1427_s30, %s1677_s30   ;;  %s1354_s29 = sphi %s1425_s29, %s1676_s29   ;;  %s1350_s28 = sphi %s1423_s28, %s1675_s28   ;;  %s1346_s27 = sphi %s1421_s27, %s1674_s27  }
   0x7   : > { %s237_s10 = sshll.u32 %s1360_s9, 4  ;;  %p906_p0 = scmp.ge.s32.totalorder %s1358_s30, 1  ;;  %s238_s10 = int_to_ptr.vmem [resolvable:$true] %s237_s10 }
   0x8   : > { %p1660_p1 = scmp.eq.s32.totalorder %s1442_s11, 0  ;;  %p225_p2 = scmp.lt.s32.totalorder %s1358_s30, 9 }
   0x9   : > { %s1361_s13 = smov [#allocation10]   ;;  %s1362_s16 = smov [#allocation9]  }
   0xa   : > { %p1448_p4 = pnand %p906_p0, %p225_p2  ;;  %s266_s14 = sshll.u32 %s1361_s13, 4  ;;  %s1460_s14 = int_to_ptr.vmem [resolvable:$true] %s266_s14 }
   0xb   : > { %s250_s17 = sshll.u32 %s1362_s16, 4  ;;  %s1167_s18 = scalar_lea.vmem %s238_s10, 1024  ;;  %s1462_s17 = int_to_ptr.vmem [resolvable:$true] %s250_s17 }
   0xc   : > { %s1663_s12 = scalar_select %p1448_p4, 1, 0 }
   0xd   : > { %p1067_p5 = pneg %p1448_p4  ;;  %p1168_p8 = scmp.ne.s32.totalorder %s238_s10, %s1167_s18 }
   0xe   : > { %p1175_p11 = scmp.lt.s32.totalorder %s238_s10, %s238_s10  ;;  %p1176_p12 = scmp.lt.s32.totalorder %s1167_s18, %s1167_s18 }
   0xf   : > { %p1456_p6 = pnand %p1067_p5, %p1660_p1 }
  0x10   : > { %p1177_p13 = por %p1176_p12, %p1175_p11 }
  0x11   : > { %p1158_p7 = pneg %p1456_p6 }
  0x13   : > { %p1170_p9 = pnand %p1168_p8, %p1158_p7 }
  0x15   : > { %p1171_p10 = pneg %p1170_p9 }
  0x17   : > { %p1178_p0 = pnand %p1177_p13, %p1171_p10 }
  0x19   : > { %1181 = shalt.err (!%p1178_p0)
}
  0x1a   : > { %s1363_s19 = smov 128   ;;  %s1364_s20 = smov 8  }
  0x1b   : > { %1070 = dma.hbm_to_vmem [thread:$0]  (!%p1456_p6), %s1652_s1, 1024, %s238_s10, [#allocation8], %s1363_s19, %s1363_s19, %s1364_s20  }
  0x1c   : > { %s1193_s23 = scalar_lea.vmem %s1460_s14, 512  ;;  %p1201_p9 = scmp.lt.s32.totalorder %s1460_s14, %s1460_s14 }
  0x1d   : > { %p1194_p2 = scmp.ne.s32.totalorder %s1460_s14, %s1193_s23  ;;  %p1202_p10 = scmp.lt.s32.totalorder %s1193_s23, %s1193_s23 }
  0x1f   : > { %p1196_p5 = pnand %p1194_p2, %p1158_p7  ;;  %p1203_p11 = por %p1202_p10, %p1201_p9 }
  0x21   : > { %p1197_p8 = pneg %p1196_p5 }
  0x23   : > { %p1204_p12 = pnand %p1203_p11, %p1197_p8 }
  0x25   : > { %1207 = shalt.err (!%p1204_p12)
}
  0x26   : > { %1076 = dma.hbm_to_vmem [thread:$0]  (!%p1456_p6), %s1655_s4, 512, %s1460_s14, [#allocation11], %s1363_s19, %s1363_s19, %s1364_s20  }
  0x27   : > { %s1219_s26 = scalar_lea.vmem %s1462_s17, 512  ;;  %p1227_p5 = scmp.lt.s32.totalorder %s1462_s17, %s1462_s17 }
  0x28   : > { %p1220_p13 = scmp.ne.s32.totalorder %s1462_s17, %s1219_s26  ;;  %p1228_p8 = scmp.lt.s32.totalorder %s1219_s26, %s1219_s26 }
  0x2a   : > { %p1222_p0 = pnand %p1220_p13, %p1158_p7  ;;  %p1229_p9 = por %p1228_p8, %p1227_p5 }
  0x2c   : > { %p1223_p2 = pneg %p1222_p0 }
  0x2e   : > { %p1230_p10 = pnand %p1229_p9, %p1223_p2 }
  0x30   : > { %1233 = shalt.err (!%p1230_p10)
}
  0x31   : > { %1073 = dma.hbm_to_vmem [thread:$0]  (!%p1456_p6), %s1653_s2, 512, %s1462_s17, [#allocation8], %s1363_s19, %s1363_s19, %s1364_s20  }
  0x32   : > { %s1365_s13 = smov [#allocation12]  }
  0x33   : > { %s282_s14 = sshll.u32 %s1365_s13, 4  ;;  %s283_s14 = int_to_ptr.vmem [resolvable:$true] %s282_s14 }
  0x34   : > { %s1245_s16 = scalar_lea.vmem %s283_s14, 2048  ;;  %p1253_p0 = scmp.lt.s32.totalorder %s283_s14, %s283_s14 }
  0x35   : > { %p1246_p11 = scmp.ne.s32.totalorder %s283_s14, %s1245_s16  ;;  %p1254_p2 = scmp.lt.s32.totalorder %s1245_s16, %s1245_s16 }
  0x37   : > { %p1248_p12 = pnand %p1246_p11, %p1158_p7  ;;  %p1255_p5 = por %p1254_p2, %p1253_p0 }
  0x39   : > { %p1249_p13 = pneg %p1248_p12 }
  0x3b   : > { %p1256_p8 = pnand %p1255_p5, %p1249_p13 }
  0x3d   : > { %1259 = shalt.err (!%p1256_p8)
}
  0x3e   : > { %1079 = dma.hbm_to_vmem [thread:$0]  (!%p1456_p6), %s1657_s6, 2048, %s283_s14, [#allocation11], %s1363_s19, %s1363_s19, %s1364_s20  }
  0x3f   : > { %s1521_s15 = sadd.s32 1, %s1358_s30   ;;  %s28_s21 = ssub.s32 7, %s1358_s30 }
  0x40   : > { %s29_s22 = ssub.s32 7, %s1521_s15  ;;  %s33_s23 = sadd.s32 1, %s1354_s29 }
  0x41   : > { %s30_s24 = ssub.s32 %s28_s21, %s29_s22  ;;  %p40_p7 = scmp.ne.s32.totalorder %s1354_s29, %s1350_s28 }
  0x42   : > { %p31_p9 = scmp.eq.s32.totalorder %s30_s24, 0  ;;  %p41_p10 = scmp.eq.s32.totalorder %s1358_s30, 0 }
  0x43   : > { %p46_p11 = scmp.ne.s32.totalorder %s1350_s28, %s1346_s27  ;;  %p1088_p12 = scmp.lt.s32.totalorder %s1358_s30, 8 }
  0x44   : > { %s1533_s25 = scalar_select %p31_p9, %s1354_s29, %s33_s23  }
  0x45   : > { %p42_p13 = por %p41_p10, %p40_p7  ;;  %p1537_p0 = por %p1660_p1, %p46_p11 }
  0x46   : > { %s299_s19 = sand.u32 1, %s1354_s29   ;;  %s913_s20 = sshll.u32 %s28_s21, 7 }
  0x47   : > { %s1665_s26 = scalar_select %p1537_p0, 1, 0 }
  0x48   : > { %s912_s9 = sshll.u32 %s299_s19, 3  ;;  %s1545_s14 = scalar_lea.hbm %s1651_s0, %s913_s20 }
  0x49   : > { %s303_s27 = scalar_lea.vmem [#allocation4], %s912_s9  ;;  %p1547_p6 = pnand %p1088_p12, %p42_p13 }
  0x4a   : > { %s311_s30 = sshll.u32 %s303_s27, 4  ;;  %s300_s17 = scalar_lea.sflag [#allocation5], %s299_s19  ;;  %s312_s30 = int_to_ptr.vmem [resolvable:$true] %s311_s30 }
  0x4b   : > { %s1260_s18 = scalar_lea.hbm %s1545_s14, 128  ;;  %p1262_p5 = pneg %p1547_p6 }
  0x4c   : > { %p1261_p2 = scmp.ne.s32.totalorder %s1545_s14, %s1260_s18  ;;  %s1265_s23 = scalar_lea.hbm %s1651_s0, 1024 }
  0x4d   : > { %p1266_p9 = scmp.lt.s32.totalorder %s1545_s14, %s1651_s0  ;;  %p1267_p10 = scmp.lt.s32.totalorder %s1265_s23, %s1260_s18 }
  0x4e   : > { %p1263_p8 = pnand %p1262_p5, %p1261_p2 }
  0x4f   : > { %p1268_p11 = por %p1267_p10, %p1266_p9 }
  0x50   : > { %p1264_p7 = pneg %p1263_p8 }
  0x52   : > { %p1269_p12 = pnand %p1268_p11, %p1264_p7 }
  0x54   : > { %1272 = shalt.err (!%p1269_p12)
}
  0x55   : > { %s1273_s9 = scalar_lea.vmem %s312_s30, 128  ;;  %s1366_s19 = smov [#allocation4]  }
  0x56   : > { %p1274_p13 = scmp.ne.s32.totalorder %s312_s30, %s1273_s9  ;;  %s1278_s10 = sshll.u32 %s1366_s19, 4  ;;  %s1279_s10 = int_to_ptr.vmem [resolvable:$false] %s1278_s10 }
  0x57   : > { %s1280_s13 = scalar_lea.vmem %s1279_s10, 256  ;;  %p1281_p2 = scmp.lt.s32.totalorder %s312_s30, %s1279_s10 }
  0x58   : > { %p1276_p3 = pnand %p1274_p13, %p1262_p5  ;;  %p1282_p8 = scmp.lt.s32.totalorder %s1280_s13, %s1273_s9 }
  0x5a   : > { %p1277_p1 = pneg %p1276_p3  ;;  %p1283_p0 = por %p1282_p8, %p1281_p2 }
  0x5c   : > { %p1284_p4 = pnand %p1283_p0, %p1277_p1 }
  0x5e   : > { %1287 = shalt.err (!%p1284_p4)
}
  0x5f   : > { %1083 = dma.hbm_to_vmem [thread:$0]  (!%p1547_p6), %s1545_s14, 128, %s312_s30, %s300_s17  }
  0x60   : > { %p1667_p7 = scmp.ne.s32.totalorder %s1663_s12, 0 }
  0x61   : > { %s322_s27 = sand.u32 (!%p1667_p7), 1, %s1350_s28   ;;  %p1668_p3 = scmp.ne.s32.totalorder (!%p1667_p7), %s1665_s26, 0 }
  0x62   : > { %320 = sbr.rel (%p1667_p7) target bundleno = 1326 (0x52e), region = 52  ;;  %s1568_s18 = sshll.u32 (!%p1667_p7), %s322_s27, 3 }
  0x63   : > { %s323_s21 = scalar_lea.sflag (!%p1667_p7), [#allocation5], %s322_s27  ;;  %s326_s22 = scalar_lea.vmem (!%p1667_p7), [#allocation4], %s1568_s18 }
  0x67   : > { %1329 = dma.done.wait (%p1668_p3), %s323_s21, 128  }
  0x68   : > { %1331 = vsyncadd (%p1668_p3), %s323_s21, 4294967168  ;;  %p1669_p1 = scmp.eq.s32.totalorder %s1442_s11, 0 }
  0x6a   : > { %1333 = dma.done.wait (%p1669_p1), [#allocation8], 1536   ;;  %p1670_p4 = pmov %p1669_p1 }
  0x6b   : > { %p1671_p0 = pmov %p1669_p1 }
  0x6c   : > { %1335 = vsyncadd (%p1670_p4), [#allocation8], 4294965760 }
  0x6d   : > { %1337 = dma.done.wait (%p1671_p0), [#allocation11], 2560   ;;  %p1672_p6 = pmov %p1671_p0 }
  0x6e   : > { %p1673_p5 = scmp.ne.s32.totalorder %s1442_s11, 0 }
  0x6f   : > { %1339 = vsyncadd (%p1672_p6), [#allocation11], 4294964736 }
  0x70   : > { %374 = sbr.rel (%p1673_p5) target bundleno = 119 (0x77), region = 76 }
  0x75   : > { %vm375_vm0 = vcmask 261120   ;;  %v1367_v0 = vmov 0.0  }
  0x76   : > { %376 = vst.msk [vmem:[#allocation2] sm:$0xff] %vm375_vm0, %v1367_v0  ;;  %377 = vst.msk [vmem:[#allocation3] sm:$0xff] %vm375_vm0, %v1367_v0 }
  0x77 PF: > { %v388_v1 = vld [vmem:[#allocation7 + $0x38] sm:$0xff]  ;;  %v1368_v2 = vmov 0.0   ;;  %v387_v3 = vld [vmem:[#allocation7 + $0x30] sm:$0xff]  ;;  %v386_v6 = vld [vmem:[#allocation7 + $0x28] sm:$0xff]  ;;  %vm393_vm1 = vcmask 261120   ;;  %vm1369_vm2 = vmmov 0  }
  0x78   : > { %980 = vmatprep.subr.mxu1 %v1368_v2  ;;  %969 = vmatprep.subr.mxu0 %v1368_v2  ;;  %v392_v4 = vld [vmem:[#allocation9 + $0x18] sm:$0xff]  ;;  %v391_v5 = vld [vmem:[#allocation9 + $0x10] sm:$0xff]  ;;  %v390_v7 = vld [vmem:[#allocation9 + $0x8] sm:$0xff]  ;;  %s1370_s12 = smov 32   ;;  %vm467_vm3 = vcmask 523264   ;;  %s1371_s30 = smov 64  }
  0x79   : > { %981 = vmatpush3.msra.mxu1 %v388_v1  ;;  %970 = vmatpush3.msra.mxu0 %v392_v4  ;;  %v385_v8 = vld [vmem:[#allocation7 + $0x20] sm:$0xff]  ;;  %v384_v10 = vld [vmem:[#allocation7 + $0x18] sm:$0xff]  ;;  %v383_v12 = vld [vmem:[#allocation7 + $0x10] sm:$0xff]  ;;  %s1372_s16 = smov 96   ;;  %p925_p9 = scmp.ne.s32.totalorder %s1442_s11, 7 }
  0x7a   : > { %982 = vmatprep.subr.mxu1 %v1368_v2  ;;  %971 = vmatprep.subr.mxu0 %v1368_v2  ;;  %v389_v9 = vld [vmem:[#allocation9] sm:$0xff]  ;;  %v382_v14 = vld [vmem:[#allocation7 + $0x8] sm:$0xff]  ;;  %v380_v16 = vld [vmem:[%s326_s22] sm:$0xff] }
  0x7b   : > { %983 = vmatpush3.msra.mxu1 %v387_v3  ;;  %972 = vmatpush3.msra.mxu0 %v391_v5  ;;  %v381_v15 = vld [vmem:[#allocation7] sm:$0xff] }
  0x7c   : > { %984 = vmatprep.subr.mxu1 %v1368_v2  ;;  %973 = vmatprep.subr.mxu0 %v1368_v2  ;;  %v923_v20 = vld [vmem:[%s1654_s3] ss:$0 sm:$0xff] }
  0x7d   : > { %985 = vmatpush3.msra.mxu1 %v386_v6  ;;  %974 = vmatpush3.msra.mxu0 %v390_v7  ;;  %v378_v11 = vld [vmem:[#allocation2] sm:$0xff]  ;;  %v379_v13 = vld [vmem:[#allocation3] sm:$0xff] }
  0x7e   : > { %986 = vmatprep.subr.mxu1 %v1368_v2  ;;  %975 = vmatprep.subr.mxu0 %v1368_v2 }
  0x7f   : > { %987 = vmatpush3.msra.mxu1 %v385_v8  ;;  %976 = vmatpush3.msra.mxu0 %v389_v9 }
  0x80   : > { %988 = vmatprep.subr.mxu1 %v1368_v2  ;;  %977 = vmatprep.mubr.msk.f32.mxu0 %vm1369_vm2, %v1368_v2 }
  0x81   : > { %989 = vmatpush3.msra.mxu1 %v384_v10  ;;  %978 = vmatmul.mubr.msk.f32.vlgmr.msra.gmra.mxu0 %vm393_vm1, %v378_v11 }
  0x82   : > { %990 = vmatprep.subr.mxu1 %v1368_v2  ;;  %996 = vmatprep.mubr.msk.f32.mxu1 %vm1369_vm2, %v1368_v2 }
  0x83   : > { %991 = vmatpush3.msra.mxu1 %v383_v12  ;;  %557 = vrot.lane.b32.xlu1 %v379_v13, %s1370_s12 }
  0x84   : > { %992 = vmatprep.subr.mxu1 %v1368_v2 }
  0x85   : > { %993 = vmatpush3.msra.mxu1 %v382_v14 }
  0x86   : > { %994 = vmatprep.subr.mxu1 %v1368_v2 }
  0x87   : > { %995 = vmatpush3.msra.mxu1 %v381_v15 }
  0x88   : > { %997 = vmatmul.mubr.msk.f32.vlgmr.msra.gmra.mxu1 %vm467_vm3, %v380_v16 }
  0xf5   : > { %v558_v34 = vpop.permute.xlu1 %557 }
 0x141   : > { %v463_v17 = vpop.f32.mrf.mxu0 }
 0x143   : > { %v979_v18 = vpop.f32.mrf.mxu0 }
 0x148   : > { %v537_v19 = vpop.f32.mrf.mxu1 }
 0x149   : > { %v538_v21 = vadd.f32 %v537_v19, %v463_v17 }
 0x14a   : > { %v998_v22 = vpop.f32.mrf.mxu1 }
 0x14b   : > { %v548_v23 = vadd.f32 %v923_v20, %v538_v21 }
 0x14d   : > { %1142 = vtanh.f32 %v548_v23  ;;  %v549_v25 = vsub.f32 0.0, %v548_v23 }
 0x14f   : > { %v550_v26 = vmul.f32 1.442695, %v549_v25 }
 0x151   : > { %1144 = vpow2.f32 %v550_v26 }
 0x15a   : > { %v1143_v24 = vpop.eup %1142 }
 0x15b   : > { %562 = vrot.lane.b32.xlu0 %v1143_v24, %s1371_s30 }
 0x15e   : > { %v1145_v27 = vpop.eup %1144 }
 0x15f   : > { %577 = vrot.lane.b32.xlu0 %v380_v16, %s1372_s16  ;;  %v552_v28 = vadd.f32 1.0, %v1145_v27 }
 0x161   : > { %1146 = vrcp.f32 %v552_v28 }
 0x16e   : > { %v1147_v29 = vpop.eup %1146 }
 0x16f   : > { %v560_v36 = vmul.f32 %v1147_v29, %v558_v34 }
 0x1cd   : > { %v563_v30 = vpop.permute.xlu0 %562 }
 0x1ce   : > { %v565_v31 = vmul.f32 %v1147_v29, %v563_v30 }
 0x1d0   : > { %567 = vrot.lane.b32.xlu1 %v565_v31, %s1370_s12 }
 0x1d1   : > { %v578_v32 = vpop.permute.xlu0 %577 }
 0x1d2   : > { %v580_v33 = vsel %vm393_vm1, %v578_v32, 0.0 }
 0x1d3   : > { %581 = vadd.xlane.f32.xlu0 %v580_v33 }
 0x242   : > { %v568_v35 = vpop.permute.xlu1 %567 }
 0x243   : > { %v570_v37 = vadd.f32 %v568_v35, %v560_v36 }
 0x245   : > { %1148 = vtanh.f32 %v570_v37 }
 0x252   : > { %v1149_v42 = vpop.eup %1148 }
 0x25c   : > { %v582_v38 = vpop.xlane.xlu0 %581 }
 0x25d   : > { %vm583_vm4 = vcmp.gt.f32.partialorder %v582_v38, 0.0 }
 0x25e   : > { %v924_v39 = vsel %vm583_vm4, 1.0, %v1368_v2 }
 0x25f   : > { %v587_v40 = vsub.f32 1.0, %v924_v39  ;;  %v599_v50 = vmul.f32 %v924_v39, %v570_v37 }
 0x261   : > { %v588_v41 = vmul.f32 %v587_v40, %v378_v11  ;;  %v600_v43 = vmul.f32 %v587_v40, %v379_v13 }
 0x263   : > { %590 = vrot.lane.b32.xlu1 %v588_v41, %s1372_s16 }
 0x267   : > { %573 = vrot.lane.b32.xlu1 %v1149_v42, %s1371_s30 }
 0x26b   : > { %602 = vrot.lane.b32.xlu1 %v600_v43, %s1370_s12 }
 0x2d5   : > { %v591_v44 = vpop.permute.xlu1 %590 }
 0x2d9   : > { %v574_v45 = vpop.permute.xlu1 %573 }
 0x2da   : > { %v576_v46 = vmul.f32 %v1147_v29, %v574_v45 }
 0x2dc   : > { %v586_v47 = vmul.f32 %v924_v39, %v576_v46 }
 0x2dd   : > { %v603_v49 = vpop.permute.xlu1 %602 }
 0x2de   : > { %v593_v48 = vadd.f32 %v591_v44, %v586_v47  ;;  %v605_v51 = vadd.f32 %v603_v49, %v599_v50 }
 0x2e0   : > { %595 = vrot.lane.b32.xlu1 %v593_v48, %s1370_s12 }
 0x2e4   : > { %607 = vrot.lane.b32.xlu1 %v605_v51, %s1372_s16 }
 0x352   : > { %v596_v52 = vpop.permute.xlu1 %595 }
 0x353   : > { %598 = vst.msk [vmem:[#allocation2] sm:$0xff] %vm393_vm1, %v596_v52  ;;  %614 = sbr.rel (%p925_p9) target bundleno = 1311 (0x51f), region = 80 }
 0x356   : > { %v608_v53 = vpop.permute.xlu1 %607 }
 0x357   : > { %610 = vst.msk [vmem:[#allocation3] sm:$0xff] %vm393_vm1, %v608_v53 }
 0x358   : > { %v619_v54 = vld [vmem:[#allocation10 + $0x18] sm:$0xff]  ;;  %v1373_v55 = vmov 0.0   ;;  %v618_v56 = vld [vmem:[#allocation10 + $0x10] sm:$0xff]  ;;  %vm1374_vm5 = vmmov 0   ;;  %v617_v59 = vld [vmem:[#allocation10 + $0x8] sm:$0xff]  ;;  %v794_v26 = vlaneseq }
 0x359   : > { %999 = vmatprep.subr.mxu0 %v1373_v55  ;;  %1007 = vmatprep.mubr.msk.f32.mxu0 %vm1374_vm5, %v1373_v55  ;;  %v716_v57 = vld [vmem:[#allocation12 + $0x78] sm:$0xff]  ;;  %v715_v58 = vld [vmem:[#allocation12 + $0x70] sm:$0xff]  ;;  %v714_v60 = vld [vmem:[#allocation12 + $0x68] sm:$0xff] }
 0x35a   : > { %1000 = vmatpush3.msra.mxu0 %v619_v54  ;;  %1010 = vmatprep.subr.mxu1 %v1373_v55  ;;  %v616_v61 = vld [vmem:[#allocation10] sm:$0xff]  ;;  %v712_v0 = vld [vmem:[#allocation12 + $0x58] sm:$0xff]  ;;  %v711_v1 = vld [vmem:[#allocation12 + $0x50] sm:$0xff]  ;;  %v795_v27 = vand.u32 127, %v794_v26 }
 0x35b   : > { %1001 = vmatprep.subr.mxu0 %v1373_v55  ;;  %1011 = vmatpush3.msra.mxu1 %v716_v57  ;;  %v615_v62 = vld [vmem:[#allocation2] sm:$0xff]  ;;  %v710_v2 = vld [vmem:[#allocation12 + $0x48] sm:$0xff]  ;;  %v708_v4 = vld [vmem:[#allocation12 + $0x38] sm:$0xff] }
 0x35c   : > { %1002 = vmatpush3.msra.mxu0 %v618_v56  ;;  %1012 = vmatprep.subr.mxu1 %v1373_v55  ;;  %v713_v63 = vld [vmem:[#allocation12 + $0x60] sm:$0xff]  ;;  %v707_v5 = vld [vmem:[#allocation12 + $0x30] sm:$0xff]  ;;  %v706_v6 = vld [vmem:[#allocation12 + $0x28] sm:$0xff]  ;;  %vm796_vm6 = vcmp.ge.s32.totalorder %v795_v27, 32  ;;  %vm797_vm7 = vcmp.lt.s32.totalorder %v795_v27, 64 }
 0x35d   : > { %1003 = vmatprep.subr.mxu0 %v1373_v55  ;;  %1013 = vmatpush3.msra.mxu1 %v715_v58  ;;  %v709_v3 = vld [vmem:[#allocation12 + $0x40] sm:$0xff]  ;;  %v704_v8 = vld [vmem:[#allocation12 + $0x18] sm:$0xff]  ;;  %v703_v9 = vld [vmem:[#allocation12 + $0x10] sm:$0xff] }
 0x35e   : > { %1004 = vmatpush3.msra.mxu0 %v617_v59  ;;  %1014 = vmatprep.subr.mxu1 %v1373_v55  ;;  %v705_v7 = vld [vmem:[#allocation12 + $0x20] sm:$0xff]  ;;  %v702_v10 = vld [vmem:[#allocation12 + $0x8] sm:$0xff]  ;;  %vm798_vm8 = vmand %vm796_vm6, %vm797_vm7 }
 0x35f   : > { %1005 = vmatprep.subr.mxu0 %v1373_v55  ;;  %1015 = vmatpush3.msra.mxu1 %v714_v60  ;;  %v701_v11 = vld [vmem:[#allocation12] sm:$0xff] }
 0x360   : > { %1006 = vmatpush3.msra.mxu0 %v616_v61  ;;  %1016 = vmatprep.subr.mxu1 %v1373_v55  ;;  %v926_v12 = vld [vmem:[%s1656_s5] ss:$0 sm:$0xff] }
 0x361   : > { %1008 = vmatmul.mubr.msk.f32.vlgmr.msra.gmra.mxu0 %vm393_vm1, %v615_v62  ;;  %1017 = vmatpush3.msra.mxu1 %v713_v63  ;;  %v928_v17 = vld [vmem:[%s1658_s7] ss:$0 sm:$0xff] }
 0x362   : > { %1018 = vmatprep.subr.mxu1 %v1373_v55  ;;  %1042 = vmatprep.mubr.msk.f32.mxu1 %vm1374_vm5, %v1373_v55 }
 0x363   : > { %1019 = vmatpush3.msra.mxu1 %v712_v0 }
 0x364   : > { %1020 = vmatprep.subr.mxu1 %v1373_v55 }
 0x365   : > { %1021 = vmatpush3.msra.mxu1 %v711_v1 }
 0x366   : > { %1022 = vmatprep.subr.mxu1 %v1373_v55 }
 0x367   : > { %1023 = vmatpush3.msra.mxu1 %v710_v2 }
 0x368   : > { %1024 = vmatprep.subr.mxu1 %v1373_v55 }
 0x369   : > { %1025 = vmatpush3.msra.mxu1 %v709_v3 }
 0x36a   : > { %1026 = vmatprep.subr.mxu1 %v1373_v55 }
 0x36b   : > { %1027 = vmatpush3.msra.mxu1 %v708_v4 }
 0x36c   : > { %1028 = vmatprep.subr.mxu1 %v1373_v55 }
 0x36d   : > { %1029 = vmatpush3.msra.mxu1 %v707_v5 }
 0x36e   : > { %1030 = vmatprep.subr.mxu1 %v1373_v55 }
 0x36f   : > { %1031 = vmatpush3.msra.mxu1 %v706_v6 }
 0x370   : > { %1032 = vmatprep.subr.mxu1 %v1373_v55 }
 0x371   : > { %1033 = vmatpush3.msra.mxu1 %v705_v7 }
 0x372   : > { %1034 = vmatprep.subr.mxu1 %v1373_v55 }
 0x373   : > { %1035 = vmatpush3.msra.mxu1 %v704_v8 }
 0x374   : > { %1036 = vmatprep.subr.mxu1 %v1373_v55 }
 0x375   : > { %1037 = vmatpush3.msra.mxu1 %v703_v9 }
 0x376   : > { %1038 = vmatprep.subr.mxu1 %v1373_v55 }
 0x377   : > { %1039 = vmatpush3.msra.mxu1 %v702_v10 }
 0x378   : > { %1040 = vmatprep.subr.mxu1 %v1373_v55 }
 0x379   : > { %1041 = vmatpush3.msra.mxu1 %v701_v11 }
 0x421   : > { %v696_v13 = vpop.f32.mrf.mxu0 }
 0x422   : > { %v697_v14 = vadd.f32 %v926_v12, %v696_v13 }
 0x423   : > { %v1009_v15 = vpop.f32.mrf.mxu0 }
 0x424   : > { %1150 = vtanh.f32 %v697_v14 }
 0x431   : > { %v1151_v16 = vpop.eup %1150 }
 0x432   : > { %1043 = vmatmul.mubr.f32.vlgmr.msra.gmra.mxu1 %v1151_v16 }
 0x4f2   : > { %v790_v18 = vpop.f32.mrf.mxu1 }
 0x4f3   : > { %v791_v19 = vadd.f32 %v928_v17, %v790_v18 }
 0x4f4   : > { %v1044_v20 = vpop.f32.mrf.mxu1 }
 0x4f5   : > { %v800_v21 = vand.u32 2147483647, %v791_v19  ;;  %v799_v29 = vmax.f32 %v791_v19, 0.0 }
 0x4f7   : > { %v801_v22 = vsub.f32 0.0, %v800_v21 }
 0x4f9   : > { %v802_v23 = vmul.f32 1.442695, %v801_v22 }
 0x4fb   : > { %1152 = vpow2.f32 %v802_v23 }
 0x508   : > { %v1153_v24 = vpop.eup %1152 }
 0x509   : > { %v804_v25 = vadd.f32 1.0, %v1153_v24 }
 0x50b   : > { %1154 = vlog2.f32 %v804_v25 }
 0x518   : > { %v1155_v28 = vpop.eup %1154 }
 0x519   : > { %v806_v30 = vmul.f32 0.6931472, %v1155_v28 }
 0x51b   : > { %v807_v31 = vadd.f32 %v806_v30, %v799_v29 }
 0x51d   : > { %v808_v32 = vsel %vm798_vm8, %v807_v31, %v791_v19 }
 0x51e   : > { %809 = vst [vmem:[#allocation13] sm:$0xff] %v808_v32 }
 0x51f PF: > { %p1093_p10 = scmp.eq.s32.totalorder %s1442_s11, 7  ;;  %s1375_s9 = smov [#allocation13]  }
 0x520   : > { %s817_s19 = sshll.u32 %s1375_s9, 4  ;;  %s818_s19 = int_to_ptr.vmem [resolvable:$true] %s817_s19 }
 0x521   : > { %s1288_s10 = scalar_lea.vmem %s818_s19, 128  ;;  %p1295_p2 = scmp.lt.s32.totalorder %s818_s19, %s818_s19 }
 0x522   : > { %p1289_p11 = scmp.ne.s32.totalorder %s818_s19, %s1288_s10  ;;  %p1296_p8 = scmp.lt.s32.totalorder %s1288_s10, %s1288_s10 }
 0x524   : > { %p1290_p12 = pnand %p1289_p11, %p1093_p10  ;;  %p1297_p7 = por %p1296_p8, %p1295_p2 }
 0x526   : > { %p1291_p13 = pneg %p1290_p12 }
 0x528   : > { %p1298_p3 = pnand %p1297_p7, %p1291_p13 }
 0x52a   : > { %1301 = shalt.err (!%p1298_p3)
}
 0x52b   : > { %1064 = dma.vmem_to_hbm [thread:$0]  (%p1093_p10), %s818_s19, 128, %s1659_s8, [#allocation6]  }
 0x52c   : > { %1341 = dma.done.wait (%p1093_p10), [#allocation6], 128  }
 0x52d   : > { %1343 = vsyncadd (%p1093_p10), [#allocation6], 4294967168 }
 0x52e PF: > { %p21_p1 = scmp.ge.s32.totalorder %s1521_s15, 10   ;;  %s1674_s27 = smov %s1350_s28 }
 0x52f   : > { %s1675_s28 = smov %s1354_s29  ;;  %s1676_s29 = smov %s1533_s25 }
 0x530   : > { %s1677_s30 = smov %s1521_s15  ;;  %23 = sbr.rel (!%p21_p1) target bundleno = 6 (0x6), region = 113 }
 0x535   :  { %830 = vsyncpa [#allocation5], 1 }
 0x536   :  { %832 = vsyncpa [#allocation5 + $0x1], 1 }
 0x537   :  { %833 = vsyncpa [#allocation8], 1 }
 0x538   :  { %834 = vsyncpa [#allocation11], 1 }
 0x539   :  { %835 = vsyncpa [#allocation6], 1 }
 0x53a   :  { %837 = vsyncpa [#allocation6 + $0x1], 1 }

</bundles_post_ra>
